<compile_context>
chip_gen: v7x
topology: tpu7x:2x2x1
jax: 0.10.0
libtpu: 0.0.40
codegen_flags: <defaults>
</compile_context>

<pallas_src>
import functools

import jax
import jax.numpy as jnp
from jax import lax
from jax.experimental import pallas as pl
from jax.experimental.pallas import tpu as pltpu

_MIB = 1024 * 1024
_LANE = 128
_MAX_TK = 16384                 # lane cap for one streamed K tile
_VMEM_HEADROOM = 16 * _MIB      # slack on top of the accounted buffers


# ----------------------------------------------------------------------------
# Hardware-aware tiling helpers
# ----------------------------------------------------------------------------
def _vmem_capacity_bytes():
    try:
        return int(pltpu.get_tpu_info().vmem_capacity_bytes)
    except Exception:
        return 64 * _MIB        # v7x per-TensorCore VMEM: safe lower bound


def _vmem_limit_bytes(needed_bytes):
    """Explicit scoped-VMEM limit computed from the actual buffers."""
    cap = _vmem_capacity_bytes()
    return int(max(4 * _MIB, min(cap - 2 * _MIB, needed_bytes + _VMEM_HEADROOM)))


def _row_blocking(n, itemsize, row_block=None):
    """(R, tr): row-block count / rows per block for the gram kernel.

    R > 1 adds a 'parallel' grid axis (sharded across v7x's two TensorCores)
    but then tr must be sublane-aligned for the streamed dtype (8 rows f32,
    16 bf16, 32 for 8-bit) because the lhs block no longer spans all rows.
    """
    align = {1: 32, 2: 16}.get(itemsize, 8)
    if (row_block is not None and row_block < n and n % row_block == 0
            and row_block % align == 0):
        return n // row_block, row_block
    if n >= 512 and n % (2 * align) == 0:
        return 2, n // 2
    return 1, n


def _choose_tk(m, per_tk_bytes, resident_bytes, k_tile=None):
    """K-tile width (lanes).  Prefers an exact divisor of m (no ragged tail,
    no host-side padding); otherwise the ragged tail is masked in-kernel."""
    if k_tile is not None:
        tk = min(int(k_tile), m)
        if tk < m:
            tk = max(_LANE, (tk // _LANE) * _LANE)
        return tk
    usable = int(_vmem_capacity_bytes() * 0.7)
    budget = max(usable - resident_bytes, 2 * _MIB)
    tk = budget // max(per_tk_bytes, 1)
    tk = max(_LANE, min(_MAX_TK, (tk // _LANE) * _LANE))
    if m <= tk:
        return m                                   # single K step, full dim
    for cand in range(tk, _LANE - 1, -_LANE):      # exact 128-multiple divisor
        if m % cand == 0:
            return cand
    return tk                                      # ragged tail, masked


def _features(x, compute_dtype):
    a, b, c, d = x.shape
    n, m = a * b, c * d
    feat = x.reshape(n, m)
    if compute_dtype is not None:
        # bf16 streaming halves HBM DMA bytes and hits native MXU rate;
        # accumulation below stays f32 (preferred_element_type).
        feat = feat.astype(compute_dtype)
    return feat, n, m, 1.0 / float(a * b * c * d)


# ----------------------------------------------------------------------------
# Kernels
# ----------------------------------------------------------------------------
def _dot_ffT(lhs, rhs):
    # Transpose-free F @ F.T: contract the last (lane) dim of both operands,
    # so no XLU transpose / extra VMEM copy of the tile; MXU accumulates f32.
    return lax.dot_general(lhs, rhs, (((1,), (1,)), ((), ())),
                           preferred_element_type=jnp.float32)


def _gram_kernel(*refs, scale, rem, shared):
    """G[row_block] += F_lhs @ F_rhs.T over the inner K axis.

    The gram *output block* is the accumulator (its index map is constant
    along K, so the block stays resident in VMEM); 1/(a*b*c*d) is applied in
    place on the last K step.  `rem` != 0 means the last K tile is ragged and
    its invalid lanes are zero-masked before hitting the MXU.
    """
    if shared:                       # single row block: one feature stream
        feat_ref, gram_ref = refs
        lhs_ref = rhs_ref = feat_ref
    else:                            # row-blocked lhs + full rhs
        lhs_ref, rhs_ref, gram_ref = refs

    k = pl.program_id(1)
    last_k = pl.num_programs(1) - 1

    @pl.when(k == 0)
    def _():
        gram_ref[...] = jnp.zeros_like(gram_ref)

    if rem == 0:
        gram_ref[...] += _dot_ffT(lhs_ref[...], rhs_ref[...])
    else:
        @pl.when(k != last_k)
        def _():
            gram_ref[...] += _dot_ffT(lhs_ref[...], rhs_ref[...])

        @pl.when(k == last_k)
        def _():
            lhs, rhs = lhs_ref[...], rhs_ref[...]
            lm = lax.broadcasted_iota(jnp.int32, lhs.shape, 1) < rem
            rm = lax.broadcasted_iota(jnp.int32, rhs.shape, 1) < rem
            gram_ref[...] += _dot_ffT(jnp.where(lm, lhs, jnp.zeros_like(lhs)),
                                      jnp.where(rm, rhs, jnp.zeros_like(rhs)))

    @pl.when(k == last_k)
    def _():
        gram_ref[...] *= scale


def _style_loss_kernel(feat_ref, tgt_ref, loss_ref, acc_ref, *,
                       scale, inv_count, rem):
    """Fused forward, loss-only: stream F over K, accumulate G in a VMEM
    scratch, last step computes mean((G*scale - target)^2) into SMEM.
    No (n, n) gram is written back to HBM."""
    k = pl.program_id(0)
    last_k = pl.num_programs(0) - 1

    @pl.when(k == 0)
    def _():
        acc_ref[...] = jnp.zeros_like(acc_ref)

    if rem == 0:
        f = feat_ref[...]
        acc_ref[...] += _dot_ffT(f, f)
    else:
        @pl.when(k != last_k)
        def _():
            f = feat_ref[...]
            acc_ref[...] += _dot_ffT(f, f)

        @pl.when(k == last_k)
        def _():
            f = feat_ref[...]
            mask = lax.broadcasted_iota(jnp.int32, f.shape, 1) < rem
            f = jnp.where(mask, f, jnp.zeros_like(f))
            acc_ref[...] += _dot_ffT(f, f)

    @pl.when(k == last_k)
    def _():
        diff = acc_ref[...] * scale - tgt_ref[...]
        loss_ref[0, 0] = jnp.sum(diff * diff) * inv_count


# ----------------------------------------------------------------------------
# Wrappers
# ----------------------------------------------------------------------------
def gram_matrix_pallas(x, *, k_tile=None, row_block=None, compute_dtype=None):
    """x: (a, b, c, d) NCHW -> gram matrix (a*b, a*b) float32."""
    feat, n, m, scale = _features(x, compute_dtype)
    isz = jnp.dtype(feat.dtype).itemsize

    R, tr = _row_blocking(n, isz, row_block)
    shared = (R == 1)
    out_bufs = 1 if shared else 2
    resident = tr * n * 4 * out_bufs                       # gram block(s)
    per_tk = (2 * n * isz) if shared else (2 * (tr + n) * isz)
    tk = _choose_tk(m, per_tk, resident, k_tile)
    kt = pl.cdiv(m, tk)
    rem = m % tk

    if shared:
        in_specs = [pl.BlockSpec((n, tk), lambda r, k: (0, k))]
        operands = (feat,)
        # Output index map is constant over the whole grid -> a second
        # pipeline buffer is pure VMEM waste: single-buffer it.
        out_spec = pl.BlockSpec((tr, n), lambda r, k: (r, 0),
                                pipeline_mode=pl.Buffered(1))
    else:
        in_specs = [pl.BlockSpec((tr, tk), lambda r, k: (r, k)),   # lhs rows
                    pl.BlockSpec((n, tk), lambda r, k: (0, k))]    # full rhs
        operands = (feat, feat)
        out_spec = pl.BlockSpec((tr, n), lambda r, k: (r, 0))

    gram = pl.pallas_call(
        functools.partial(_gram_kernel, scale=scale, rem=rem, shared=shared),
        out_shape=jax.ShapeDtypeStruct((n, n), jnp.float32),
        grid_spec=pltpu.PrefetchScalarGridSpec(
            num_scalar_prefetch=0,
            grid=(R, kt),
            in_specs=in_specs,
            out_specs=out_spec,
        ),
        compiler_params=pltpu.CompilerParams(
            dimension_semantics=("parallel", "arbitrary"),
            vmem_limit_bytes=_vmem_limit_bytes(resident + per_tk * tk),
        ),
    )(*operands)
    return gram


def style_loss_forward(x, target_gram, *, k_tile=None, compute_dtype=None):
    """Returns (x, loss).  x passes through unchanged, loss = mse(G, target)."""
    feat, n, m, scale = _features(x, compute_dtype)
    isz = jnp.dtype(feat.dtype).itemsize
    inv_count = 1.0 / float(n * n)          # F.mse_loss reduction='mean'
    tgt = target_gram.astype(jnp.float32)

    resident = 2 * n * n * 4                # f32 accumulator + resident target
    per_tk = 2 * n * isz                    # double-buffered feature stream
    tk = _choose_tk(m, per_tk, resident, k_tile)
    kt = pl.cdiv(m, tk)
    rem = m % tk

    loss = pl.pallas_call(
        functools.partial(_style_loss_kernel, scale=scale,
                          inv_count=inv_count, rem=rem),
        out_shape=jax.ShapeDtypeStruct((1, 1), jnp.float32),
        grid_spec=pltpu.PrefetchScalarGridSpec(
            num_scalar_prefetch=0,
            grid=(kt,),
            in_specs=[
                pl.BlockSpec((n, tk), lambda k: (0, k)),        # streamed F
                pl.BlockSpec((n, n), lambda k: (0, 0),          # resident target
                             pipeline_mode=pl.Buffered(1)),
            ],
            out_specs=pl.BlockSpec((1, 1), lambda k: (0, 0),
                                   memory_space=pltpu.SMEM),    # scalar loss
            scratch_shapes=[pltpu.VMEM((n, n), jnp.float32)],
        ),
        compiler_params=pltpu.CompilerParams(
            dimension_semantics=("arbitrary",),
            vmem_limit_bytes=_vmem_limit_bytes(resident + per_tk * tk),
        ),
    )(feat, tgt)
    return x, loss[0, 0]


class StyleLoss:
    """Mirror of the PyTorch module: caches gram(target_feature) at init;
    __call__ returns its input unchanged and records self.loss.

    compute_dtype=jnp.bfloat16 streams the features in bf16 (f32 accumulation
    kept); gram/loss then differ from the f32 reference at the bf16-mantissa
    level (~1e-2 relative).  Default None preserves exact f32 semantics.
    """

    def __init__(self, target_feature, *, k_tile=None, row_block=None,
                 compute_dtype=None):
        self._k_tile = k_tile
        self._compute_dtype = compute_dtype
        self.target = gram_matrix_pallas(target_feature, k_tile=k_tile,
                                         row_block=row_block,
                                         compute_dtype=compute_dtype)
        self.loss = None

    def __call__(self, x):
        out, loss = style_loss_forward(x, self.target, k_tile=self._k_tile,
                                       compute_dtype=self._compute_dtype)
        self.loss = loss
        return out


# ----------------------------------------------------------------------------
# Pure-JAX reference
# ----------------------------------------------------------------------------
def _gram_ref(x):
    a, b, c, d = x.shape
    f = x.reshape(a * b, c * d).astype(jnp.float32)
    return (f @ f.T) / float(a * b * c * d)


if __name__ == "__main__":
    key = jax.random.PRNGKey(0)
    ks = jax.random.split(key, 10)

    def _check(module, x, atol=1e-5, rtol=1e-5, l_atol=1e-5, l_rtol=1e-5):
        out = module(x)
        jax.block_until_ready(out)
        jax.block_until_ready(module.loss)
        g_ref = _gram_ref(x)
        t_ref = _gram_ref(tf_cur)
        loss_ref = jnp.mean((g_ref - t_ref) ** 2)
        assert out.shape == x.shape and jnp.allclose(out, x)      # passthrough
        assert jnp.allclose(module.target, t_ref, atol=atol, rtol=rtol)
        assert jnp.allclose(module.loss, loss_ref, atol=l_atol, rtol=l_rtol)

    # --- 1. base case: single K step, single row block ----------------------
    tf_cur = jax.random.normal(ks[0], (2, 4, 16, 16), jnp.float32)
    x1 = jax.random.normal(ks[1], (2, 4, 16, 16), jnp.float32)
    _check(StyleLoss(tf_cur), x1)

    # --- 2. unaligned n = 15 (no padding), forced 2-step K pipeline ---------
    tf_cur = jax.random.normal(ks[2], (3, 5, 16, 16), jnp.float32)
    x2 = jax.random.normal(ks[3], (3, 5, 16, 16), jnp.float32)
    _check(StyleLoss(tf_cur, k_tile=128), x2)

    # --- 3. row-blocked ('parallel') gram path, dual-operand stream ---------
    xg = jax.random.normal(ks[4], (2, 16, 16, 16), jnp.float32)   # n = 32
    g_blk = gram_matrix_pallas(xg, row_block=16)
    jax.block_until_ready(g_blk)
    assert jnp.allclose(g_blk, _gram_ref(xg), atol=1e-5, rtol=1e-5)

    # --- 4. ragged last K tile (m = 250, tk = 128 -> in-kernel mask) --------
    tf_cur = jax.random.normal(ks[5], (2, 4, 10, 25), jnp.float32)
    x4 = jax.random.normal(ks[6], (2, 4, 10, 25), jnp.float32)
    _check(StyleLoss(tf_cur, k_tile=128), x4)

    # --- 5. bf16 feature streaming (documented looser tolerance) ------------
    tf_cur = jax.random.normal(ks[7], (2, 4, 16, 16), jnp.float32)
    x5 = jax.random.normal(ks[8], (2, 4, 16, 16), jnp.float32)
    _check(StyleLoss(tf_cur, compute_dtype=jnp.bfloat16), x5,
           atol=5e-3, rtol=5e-2, l_atol=5e-5, l_rtol=1e-1)

    print("KERNEL_OK")
</pallas_src>

<mosaic_0001>
module attributes {stable_mosaic.version = 11 : i64} {
  func.func @_gram_kernel(%arg0: i32, %arg1: i32, %arg2: memref<8x256xf32, #tpu.memory_space<vmem>>, %arg3: memref<8x8xf32, #tpu.memory_space<vmem>>) attributes {dimension_semantics = [#tpu.dimension_semantics<parallel>, #tpu.dimension_semantics<arbitrary>], iteration_bounds = array<i64: 1, 1>, scalar_prefetch = 0 : i64, scratch_operands = 0 : i64, tpu.core_type = #tpu.core_type<tc>, window_params = [{transform_indices = @transform_0, window_bounds = array<i64: 8, 256>}, {pipeline_mode = #tpu.pipeline_mode<synchronous>, transform_indices = @transform_1, window_bounds = array<i64: 8, 8>}]} {
    %c0_i32 = arith.constant 0 : i32
    %0 = arith.cmpi eq, %arg1, %c0_i32 : i32
    %1 = arith.extui %0 : i1 to i32
    %c0_i32_0 = arith.constant 0 : i32
    %2 = arith.cmpi ne, %1, %c0_i32_0 : i32
    scf.if %2 {
      %cst_10 = arith.constant 0.000000e+00 : f32
      %12 = vector.broadcast %cst_10 : f32 to vector<8x8xf32>
      %c0_11 = arith.constant 0 : index
      %c0_12 = arith.constant 0 : index
      %13 = vector.load %arg3[%c0_11, %c0_12] : memref<8x8xf32, #tpu.memory_space<vmem>>, vector<8x8xf32>
      tpu.vector_store %arg3[%c0_11, %c0_12], %12 {strides = array<i32>} : memref<8x8xf32, #tpu.memory_space<vmem>>, vector<8x8xf32>,
    } else {
    }
    %c0 = arith.constant 0 : index
    %c0_1 = arith.constant 0 : index
    %3 = vector.load %arg3[%c0, %c0_1] : memref<8x8xf32, #tpu.memory_space<vmem>>, vector<8x8xf32>
    %c0_2 = arith.constant 0 : index
    %c0_3 = arith.constant 0 : index
    %4 = vector.load %arg2[%c0_2, %c0_3] : memref<8x256xf32, #tpu.memory_space<vmem>>, vector<8x256xf32>
    %c0_4 = arith.constant 0 : index
    %c0_5 = arith.constant 0 : index
    %5 = vector.load %arg2[%c0_4, %c0_5] : memref<8x256xf32, #tpu.memory_space<vmem>>, vector<8x256xf32>
    %cst = arith.constant dense<0.000000e+00> : vector<8x8xf32>
    %6 = tpu.matmul %4, %5, %cst {dimension_numbers = #tpu.dot_dimension_numbers<[1], [1], [0], [0], [0, 0, 1, 0], [], []>} : vector<8x256xf32>, vector<8x256xf32>, vector<8x8xf32> -> vector<8x8xf32>
    %7 = arith.addf %3, %6 : vector<8x8xf32>
    %c0_6 = arith.constant 0 : index
    %c0_7 = arith.constant 0 : index
    %8 = vector.load %arg3[%c0_6, %c0_7] : memref<8x8xf32, #tpu.memory_space<vmem>>, vector<8x8xf32>
    tpu.vector_store %arg3[%c0_6, %c0_7], %7 {strides = array<i32>} : memref<8x8xf32, #tpu.memory_space<vmem>>, vector<8x8xf32>,
    %c0_i32_8 = arith.constant 0 : i32
    %9 = arith.cmpi eq, %arg1, %c0_i32_8 : i32
    %10 = arith.extui %9 : i1 to i32
    %c0_i32_9 = arith.constant 0 : i32
    %11 = arith.cmpi ne, %10, %c0_i32_9 : i32
    scf.if %11 {
      %c0_10 = arith.constant 0 : index
      %c0_11 = arith.constant 0 : index
      %12 = vector.load %arg3[%c0_10, %c0_11] : memref<8x8xf32, #tpu.memory_space<vmem>>, vector<8x8xf32>
      %cst_12 = arith.constant 4.8828125E-4 : f32
      %13 = vector.broadcast %cst_12 : f32 to vector<8x8xf32>
      %14 = arith.mulf %12, %13 : vector<8x8xf32>
      %c0_13 = arith.constant 0 : index
      %c0_14 = arith.constant 0 : index
      %15 = vector.load %arg3[%c0_13, %c0_14] : memref<8x8xf32, #tpu.memory_space<vmem>>, vector<8x8xf32>
      tpu.vector_store %arg3[%c0_13, %c0_14], %14 {strides = array<i32>} : memref<8x8xf32, #tpu.memory_space<vmem>>, vector<8x8xf32>,
    } else {
    }
    return
  }
  func.func @transform_0(%arg0: i32, %arg1: i32) -> (i32, i32) {
    %c0_i32 = arith.constant 0 : i32
    %c0_i32_0 = arith.constant 0 : i32
    return %c0_i32, %arg1 : i32, i32
  }
  func.func @transform_1(%arg0: i32, %arg1: i32) -> (i32, i32) {
    %c0_i32 = arith.constant 0 : i32
    %c0_i32_0 = arith.constant 0 : i32
    return %arg0, %c0_i32 : i32, i32
  }
}

</mosaic_0001>

<bundles_post_ra>
// kernel: tpu_custom_call.1
= control target key start
LH: loop header
LB: loop body
LE: loop exit
PB: predicated region body
PF: predicated region fallthrough
CT: control target
= control target key end

     0   :  { %6 = vsyncpa [#allocation3], 0  ;;  %s215_s0 = inlined_call_operand.hbm [shape: f32[8,256], index: 0, kind: input, shape index: {}]   ;;  %s216_s1 = inlined_call_operand.hbm [shape: f32[8,8], index: 1, kind: output, shape index: {}]  }
   0x1   :  { %7 = vsyncpa [#allocation4], 0  ;;  %s175_s6 = smov [#allocation2]   ;;  %s127_s10 = scalar_lea.hbm %s215_s0, 256 }
   0x2   :  { %s14_s7 = sshll.u32 %s175_s6, 4  ;;  %p128_p0 = scmp.ne.s32.totalorder %s215_s0, %s127_s10  ;;  %s15_s7 = int_to_ptr.vmem [resolvable:$true] %s14_s7 }
   0x3   :  { %p131_p1 = scmp.lt.u32.totalorder %s127_s10, %s215_s0 }
   0x5   :  { %p133_p2 = pnand %p131_p1, %p128_p0 }
   0x7   :  { %136 = shalt.err (!%p133_p2)
}
   0x8   :  { %s137_s15 = scalar_lea.vmem %s15_s7, 256  ;;  %p142_p4 = scmp.lt.s32.totalorder %s15_s7, %s15_s7 }
   0x9   :  { %p138_p3 = scmp.ne.s32.totalorder %s15_s7, %s137_s15  ;;  %p143_p5 = scmp.lt.s32.totalorder %s137_s15, %s137_s15 }
   0xb   :  { %p144_p6 = por %p143_p5, %p142_p4 }
   0xd   :  { %p145_p7 = pnand %p144_p6, %p138_p3 }
   0xf   :  { %148 = shalt.err (!%p145_p7)
}
  0x10   :  { %17 = dma.hbm_to_vmem [thread:$0]  %s215_s0, 256, %s15_s7, [#allocation3]  }
  0x11   :  { %171 = dma.done.wait [#allocation3], 256  }
  0x12   :  { %172 = vsyncadd [#allocation3], 4294967040  ;;  %vm25_vm0 = vcmask 64512   ;;  %v176_v0 = vmov 0.0   ;;  %v29_v1 = vld [vmem:[#allocation2 + $0x8] sm:$0xff]  ;;  %v28_v2 = vld [vmem:[#allocation2] sm:$0xff] }
  0x13   :  { %26 = vst.msk [vmem:[#allocation5] sm:$0xff] %vm25_vm0, %v176_v0  ;;  %30 = vmatprep.subr.mxu0 %v29_v1  ;;  %94 = vmatprep.mubr.f32.mxu0 %v29_v1  ;;  %s177_s18 = smov [#allocation5]  }
  0x14   :  { %31 = vmatpush1.xpose.msra.mxu0 %v28_v2  ;;  %s115_s0 = sshll.u32 %s177_s18, 4  ;;  %s116_s0 = int_to_ptr.vmem [resolvable:$true] %s115_s0 }
  0x15   :  { %s149_s19 = scalar_lea.vmem %s116_s0, 128  ;;  %p154_p9 = scmp.lt.s32.totalorder %s116_s0, %s116_s0 }
  0x16   :  { %p150_p8 = scmp.ne.s32.totalorder %s116_s0, %s149_s19  ;;  %p155_p10 = scmp.lt.s32.totalorder %s149_s19, %s149_s19 }
  0x17   :  { %95 = vmatmul.mubr.f32.vlgmr.msra.gmra.mrb[0].mxu0 %v28_v2 }
  0x18   :  { %p156_p11 = por %p155_p10, %p154_p9 }
  0x1a   :  { %v27_v3 = vld [vmem:[#allocation5] sm:$0xff]  ;;  %p157_p12 = pnand %p156_p11, %p150_p8 }
  0xea   :  { %v96_v4 = vpop.f32.mrb[0].mxu0 }
  0xeb   :  { %v100_v5 = vadd.f32 %v96_v4, %v27_v3  ;;  %v98_v6 = vpop.f32.mrb[1].mxu0 }
  0xed   :  { %102 = vst.msk [vmem:[#allocation5] sm:$0xff] %vm25_vm0, %v100_v5 }
  0xf4   :  { %v106_v7 = vld [vmem:[#allocation5] sm:$0xff] }
  0xf5   :  { %v107_v8 = vmul.f32 0.00048828125, %v106_v7 }
  0xf7   :  { %108 = vst.msk [vmem:[#allocation5] sm:$0xff] %vm25_vm0, %v107_v8 }
  0xf8   :  { %160 = shalt.err (!%p157_p12)
}
  0xf9   :  { %s161_s22 = scalar_lea.hbm %s216_s1, 128 }
  0xfa   :  { %p162_p13 = scmp.ne.s32.totalorder %s216_s1, %s161_s22  ;;  %p165_p0 = scmp.lt.u32.totalorder %s161_s22, %s216_s1 }
  0xfc   :  { %p167_p1 = pnand %p165_p0, %p162_p13 }
  0xfe   :  { %170 = shalt.err (!%p167_p1)
}
  0xff   :  { %118 = dma.vmem_to_hbm [thread:$0]  %s116_s0, 128, %s216_s1, [#allocation4]  }
 0x100   :  { %173 = dma.done.wait [#allocation4], 128  }
 0x101   :  { %174 = vsyncadd [#allocation4], 4294967168 }
 0x102   :  { %122 = vsyncpa [#allocation3], 1 }
 0x103   :  { %123 = vsyncpa [#allocation4], 1 }

</bundles_post_ra>
